<compile_context>
chip_gen: v6e
topology: v6e:2x2x1
jax: 0.10.0
libtpu: 0.0.40
codegen_flags: <defaults>
</compile_context>

<pallas_src>
import jax
import jax.numpy as jnp
from jax.experimental import pallas as pl
from jax.experimental.pallas import tpu as pltpu


def _round_up(x, m):
    return (x + m - 1) // m * m


def _linearnet_kernel(x_ref, w1_ref, b1_ref, w2_ref, b2_ref, w3_ref, b3_ref,
                      out_ref):
    """Forward pass for one batch tile, entirely in VMEM.

    x_ref : (TB, LLS)      f32 (bf16 cast happens here, not in the wrapper)
    w1    : (LLS, 256)  bf16    b1 : (1, 256)   f32
    w2    : (256, 128)  bf16    b2 : (1, 128)   f32
    w3    : (128, LABP) bf16    b3 : (1, LABP)  f32 (padded lanes = -1e30)
    out   : (TB, LABP)  f32 log-probs (padded lanes sliced off in the wrapper)
    """
    x = x_ref[...].astype(jnp.bfloat16)

    # fc1 + ReLU   (bf16 operands -> f32 accumulation on the MXU)
    h1 = jnp.dot(x, w1_ref[...], preferred_element_type=jnp.float32)
    h1 = jnp.maximum(h1 + b1_ref[...], 0.0)

    # fc2 + ReLU
    h2 = jnp.dot(h1.astype(jnp.bfloat16), w2_ref[...],
                 preferred_element_type=jnp.float32)
    h2 = jnp.maximum(h2 + b2_ref[...], 0.0)

    # fc3 (logits).  Padded W3 columns are zero and padded b3 lanes are -1e30,
    # so padded logits come out as -1e30 with no explicit masking work.
    z = jnp.dot(h2.astype(jnp.bfloat16), w3_ref[...],
                preferred_element_type=jnp.float32)
    z = z + b3_ref[...]

    # log_softmax along the label axis (dim=1), all in f32.  exp(-1e30 - m)
    # underflows to exactly 0, so padded lanes don't perturb the sum.
    m = jnp.max(z, axis=-1, keepdims=True)
    shifted = z - m
    lse = jnp.log(jnp.sum(jnp.exp(shifted), axis=-1, keepdims=True))
    out_ref[...] = (shifted - lse).astype(out_ref.dtype)


def _pick_batch_tile(batch, lls, lab_pad):
    """Adaptive batch tile (MXU M / DMA row count).

    * tiny B: round up to the f32 sublane granularity (8) -> no wasted rows
      and (usually) no wrapper-side batch pad for small-batch inference,
    * large B: ~B/2 capped at 512, so there are always >= 2 grid tiles for the
      "parallel" axis (both v7x TensorCores fed) and the double-buffered f32
      x tile stays well inside v5e's 16 MiB scoped-VMEM default.
    """
    if batch < 32:
        return _round_up(batch, 8)
    tb = min(512, _round_up((batch + 1) // 2, 16))
    # Rough VMEM budget per batch row: double-buffered f32 x + f32 out tiles
    # plus the f32 h1/h2/z intermediates.
    row_bytes = 4 * (2 * lls + 2 * lab_pad + 256 + 128 + lab_pad)
    cap = max(16, ((8 * 1024 * 1024) // row_bytes) // 16 * 16)
    return min(tb, cap)


@jax.jit
def linearnet_forward(x_nchw, w1, b1, w2, b2, w3, b3):
    """x_nchw: (B, 1, H, W) float32.  Returns (B, labels) f32 log-probs."""
    B = x_nchw.shape[0]
    lls = w1.shape[0]
    labels = w3.shape[1]
    lab_pad = _round_up(labels, 128)

    tb = _pick_batch_tile(B, lls, lab_pad)
    b_pad = _round_up(B, tb)
    n_tiles = b_pad // tb

    # Flatten NCHW -> (B, lls).  No dtype cast, no feature-dim padding: x
    # crosses HBM once and is cast to bf16 inside the kernel.  Batch rows are
    # only padded when B isn't a tile multiple (cheap / usually a no-op).
    x2d = x_nchw.reshape(B, lls)
    if b_pad != B:
        x2d = jnp.pad(x2d, ((0, b_pad - B), (0, 0)))

    # Weights: bf16 for the MXU.  Only W3/b3 need the one-time label-lane pad;
    # b3's fake lanes carry -1e30 so the bias add doubles as the logit mask.
    w1c = w1.astype(jnp.bfloat16)
    w2c = w2.astype(jnp.bfloat16)
    w3p = jnp.pad(w3, ((0, 0), (0, lab_pad - labels))).astype(jnp.bfloat16)

    b1r = b1.reshape(1, -1).astype(jnp.float32)
    b2r = b2.reshape(1, -1).astype(jnp.float32)
    b3r = jnp.pad(b3.reshape(1, -1).astype(jnp.float32),
                  ((0, 0), (0, lab_pad - labels)),
                  constant_values=-1e30)

    grid_spec = pltpu.PrefetchScalarGridSpec(
        num_scalar_prefetch=0,
        grid=(n_tiles,),
        in_specs=[
            # Activations: one (tb, lls) tile per grid step; full-extent K
            # block (legal even when lls % 128 != 0), double-buffered.
            pl.BlockSpec((tb, lls), lambda i: (i, 0)),
            # Weights / biases: constant index_map -> DMA once, VMEM-resident.
            pl.BlockSpec((lls, 256), lambda i: (0, 0)),
            pl.BlockSpec((1, 256), lambda i: (0, 0)),
            pl.BlockSpec((256, 128), lambda i: (0, 0)),
            pl.BlockSpec((1, 128), lambda i: (0, 0)),
            pl.BlockSpec((128, lab_pad), lambda i: (0, 0)),
            pl.BlockSpec((1, lab_pad), lambda i: (0, 0)),
        ],
        out_specs=pl.BlockSpec((tb, lab_pad), lambda i: (i, 0)),
    )

    flops = 2 * b_pad * (lls * 256 + 256 * 128 + 128 * lab_pad)
    bytes_accessed = (
        b_pad * lls * 4                              # x (f32, read once)
        + (w1c.size + w2c.size + w3p.size) * 2       # weights (bf16)
        + (b1r.size + b2r.size + b3r.size) * 4       # biases (f32)
        + b_pad * lab_pad * 4                        # output (f32)
    )
    transcendentals = b_pad * lab_pad + b_pad        # exp per logit + log per row

    out_padded = pl.pallas_call(
        _linearnet_kernel,
        out_shape=jax.ShapeDtypeStruct((b_pad, lab_pad), jnp.float32),
        grid_spec=grid_spec,
        compiler_params=pltpu.CompilerParams(
            dimension_semantics=("parallel",)),
        cost_estimate=pl.CostEstimate(
            flops=flops,
            bytes_accessed=bytes_accessed,
            transcendentals=transcendentals),
    )(x2d, w1c, b1r, w2c, b2r, w3p, b3r)

    # Slice away batch/label padding.
    return out_padded[:B, :labels]


def _reference_forward(x_nchw, w1, b1, w2, b2, w3, b3):
    """Pure-JAX f32 reference of the PyTorch module's forward."""
    B = x_nchw.shape[0]
    x = x_nchw.reshape(B, -1).astype(jnp.float32)
    h1 = jnp.maximum(x @ w1 + b1, 0.0)
    h2 = jnp.maximum(h1 @ w2 + b2, 0.0)
    z = h2 @ w3 + b3
    return jax.nn.log_softmax(z, axis=-1)


def init_params(key, img_size, labels):
    """Deterministic init mimicking nn.Linear's uniform fan-in init.

    Weights are stored transposed vs PyTorch: (in_features, out_features).
    """
    lls = img_size * img_size
    dims = [(lls, 256), (256, 128), (128, labels)]
    params = []
    keys = jax.random.split(key, 2 * len(dims))
    for i, (fan_in, fan_out) in enumerate(dims):
        bound = 1.0 / float(fan_in) ** 0.5
        w = jax.random.uniform(keys[2 * i], (fan_in, fan_out),
                               minval=-bound, maxval=bound, dtype=jnp.float32)
        b = jax.random.uniform(keys[2 * i + 1], (fan_out,),
                               minval=-bound, maxval=bound, dtype=jnp.float32)
        params.extend([w, b])
    return params


if __name__ == "__main__":
    key = jax.random.PRNGKey(0)
    k_x, k_p = jax.random.split(key)

    batch = 8
    img_size = 16          # lls = 256
    labels = 10

    # NCHW input, as the PyTorch module would receive (B, 1, H, W) images.
    x = jax.random.normal(k_x, (batch, 1, img_size, img_size),
                          dtype=jnp.float32)
    w1, b1, w2, b2, w3, b3 = init_params(k_p, img_size, labels)

    logits = linearnet_forward(x, w1, b1, w2, b2, w3, b3)
    jax.block_until_ready(logits)

    # Sanity: shape, rows sum to ~1 in prob space, matches f32 reference to
    # bf16 tolerance.
    assert logits.shape == (batch, labels)
    probs_sum = jnp.sum(jnp.exp(logits), axis=-1)
    assert bool(jnp.all(jnp.abs(probs_sum - 1.0) < 1e-4))

    ref = _reference_forward(x, w1, b1, w2, b2, w3, b3)
    assert bool(jnp.all(jnp.abs(logits - ref) < 0.1)), "mismatch vs reference"

    print("KERNEL_OK")
</pallas_src>

<mosaic_0001>
module attributes {stable_mosaic.version = 11 : i64} {
  func.func @_linearnet_kernel(%arg0: i32, %arg1: memref<8x256xf32, #tpu.memory_space<vmem>>, %arg2: memref<256x256xbf16, #tpu.memory_space<vmem>>, %arg3: memref<1x256xf32, #tpu.memory_space<vmem>>, %arg4: memref<256x128xbf16, #tpu.memory_space<vmem>>, %arg5: memref<1x128xf32, #tpu.memory_space<vmem>>, %arg6: memref<128x128xbf16, #tpu.memory_space<vmem>>, %arg7: memref<1x128xf32, #tpu.memory_space<vmem>>, %arg8: memref<8x128xf32, #tpu.memory_space<vmem>>) attributes {dimension_semantics = [#tpu.dimension_semantics<parallel>], iteration_bounds = array<i64: 1>, scalar_prefetch = 0 : i64, scratch_operands = 0 : i64, tpu.core_type = #tpu.core_type<tc>, window_params = [{transform_indices = @transform_0, window_bounds = array<i64: 8, 256>}, {pipeline_mode = #tpu.pipeline_mode<synchronous>, transform_indices = @transform_1, window_bounds = array<i64: 256, 256>}, {pipeline_mode = #tpu.pipeline_mode<synchronous>, transform_indices = @transform_2, window_bounds = array<i64: 1, 256>}, {pipeline_mode = #tpu.pipeline_mode<synchronous>, transform_indices = @transform_3, window_bounds = array<i64: 256, 128>}, {pipeline_mode = #tpu.pipeline_mode<synchronous>, transform_indices = @transform_4, window_bounds = array<i64: 1, 128>}, {pipeline_mode = #tpu.pipeline_mode<synchronous>, transform_indices = @transform_5, window_bounds = array<i64: 128, 128>}, {pipeline_mode = #tpu.pipeline_mode<synchronous>, transform_indices = @transform_6, window_bounds = array<i64: 1, 128>}, {transform_indices = @transform_7, window_bounds = array<i64: 8, 128>}]} {
    %c0 = arith.constant 0 : index
    %c0_0 = arith.constant 0 : index
    %0 = vector.load %arg1[%c0, %c0_0] : memref<8x256xf32, #tpu.memory_space<vmem>>, vector<8x256xf32>
    %1 = arith.truncf %0 : vector<8x256xf32> to vector<8x256xbf16>
    %c0_1 = arith.constant 0 : index
    %c0_2 = arith.constant 0 : index
    %2 = vector.load %arg2[%c0_1, %c0_2] : memref<256x256xbf16, #tpu.memory_space<vmem>>, vector<256x256xbf16>
    %cst = arith.constant dense<0.000000e+00> : vector<8x256xf32>
    %3 = tpu.matmul %1, %2, %cst {dimension_numbers = #tpu.dot_dimension_numbers<[1], [0], [0], [1], [0, 0, 1, 1], [], []>} : vector<8x256xbf16>, vector<256x256xbf16>, vector<8x256xf32> -> vector<8x256xf32>
    %c0_3 = arith.constant 0 : index
    %c0_4 = arith.constant 0 : index
    %4 = vector.load %arg3[%c0_3, %c0_4] : memref<1x256xf32, #tpu.memory_space<vmem>>, vector<1x256xf32>
    %5 = vector.broadcast %4 : vector<1x256xf32> to vector<8x256xf32>
    %6 = arith.addf %3, %5 : vector<8x256xf32>
    %cst_5 = arith.constant 0.000000e+00 : f32
    %7 = vector.broadcast %cst_5 : f32 to vector<8x256xf32>
    %8 = arith.maximumf %6, %7 : vector<8x256xf32>
    %9 = arith.truncf %8 : vector<8x256xf32> to vector<8x256xbf16>
    %c0_6 = arith.constant 0 : index
    %c0_7 = arith.constant 0 : index
    %10 = vector.load %arg4[%c0_6, %c0_7] : memref<256x128xbf16, #tpu.memory_space<vmem>>, vector<256x128xbf16>
    %cst_8 = arith.constant dense<0.000000e+00> : vector<8x128xf32>
    %11 = tpu.matmul %9, %10, %cst_8 {dimension_numbers = #tpu.dot_dimension_numbers<[1], [0], [0], [1], [0, 0, 1, 1], [], []>} : vector<8x256xbf16>, vector<256x128xbf16>, vector<8x128xf32> -> vector<8x128xf32>
    %c0_9 = arith.constant 0 : index
    %c0_10 = arith.constant 0 : index
    %12 = vector.load %arg5[%c0_9, %c0_10] : memref<1x128xf32, #tpu.memory_space<vmem>>, vector<1x128xf32>
    %13 = vector.broadcast %12 : vector<1x128xf32> to vector<8x128xf32>
    %14 = arith.addf %11, %13 : vector<8x128xf32>
    %cst_11 = arith.constant 0.000000e+00 : f32
    %15 = vector.broadcast %cst_11 : f32 to vector<8x128xf32>
    %16 = arith.maximumf %14, %15 : vector<8x128xf32>
    %17 = arith.truncf %16 : vector<8x128xf32> to vector<8x128xbf16>
    %c0_12 = arith.constant 0 : index
    %c0_13 = arith.constant 0 : index
    %18 = vector.load %arg6[%c0_12, %c0_13] : memref<128x128xbf16, #tpu.memory_space<vmem>>, vector<128x128xbf16>
    %cst_14 = arith.constant dense<0.000000e+00> : vector<8x128xf32>
    %19 = tpu.matmul %17, %18, %cst_14 {dimension_numbers = #tpu.dot_dimension_numbers<[1], [0], [0], [1], [0, 0, 1, 1], [], []>} : vector<8x128xbf16>, vector<128x128xbf16>, vector<8x128xf32> -> vector<8x128xf32>
    %c0_15 = arith.constant 0 : index
    %c0_16 = arith.constant 0 : index
    %20 = vector.load %arg7[%c0_15, %c0_16] : memref<1x128xf32, #tpu.memory_space<vmem>>, vector<1x128xf32>
    %21 = vector.broadcast %20 : vector<1x128xf32> to vector<8x128xf32>
    %22 = arith.addf %19, %21 : vector<8x128xf32>
    %cst_17 = arith.constant dense<0xFF800000> : vector<8xf32>
    %23 = vector.multi_reduction <maximumf>, %22, %cst_17 [1] : vector<8x128xf32> to vector<8xf32>
    %24 = vector.shape_cast %23 : vector<8xf32> to vector<8x1xf32>
    %25 = vector.broadcast %24 : vector<8x1xf32> to vector<8x128xf32>
    %26 = arith.subf %22, %25 : vector<8x128xf32>
    %27 = math.exp %26 : vector<8x128xf32>
    %cst_18 = arith.constant dense<0.000000e+00> : vector<8xf32>
    %28 = vector.multi_reduction <add>, %27, %cst_18 [1] : vector<8x128xf32> to vector<8xf32>
    %29 = vector.shape_cast %28 : vector<8xf32> to vector<8x1xf32>
    %30 = math.log %29 : vector<8x1xf32>
    %31 = vector.broadcast %30 : vector<8x1xf32> to vector<8x128xf32>
    %32 = arith.subf %26, %31 : vector<8x128xf32>
    %c0_19 = arith.constant 0 : index
    %c0_20 = arith.constant 0 : index
    %33 = vector.load %arg8[%c0_19, %c0_20] : memref<8x128xf32, #tpu.memory_space<vmem>>, vector<8x128xf32>
    tpu.vector_store %arg8[%c0_19, %c0_20], %32 {strides = array<i32>} : memref<8x128xf32, #tpu.memory_space<vmem>>, vector<8x128xf32>,
    return
  }
  func.func @transform_0(%arg0: i32) -> (i32, i32) {
    %c0_i32 = arith.constant 0 : i32
    %c0_i32_0 = arith.constant 0 : i32
    return %arg0, %c0_i32 : i32, i32
  }
  func.func @transform_1(%arg0: i32) -> (i32, i32) {
    %c0_i32 = arith.constant 0 : i32
    %c0_i32_0 = arith.constant 0 : i32
    %c0_i32_1 = arith.constant 0 : i32
    return %c0_i32, %c0_i32_0 : i32, i32
  }
  func.func @transform_2(%arg0: i32) -> (i32, i32) {
    %c0_i32 = arith.constant 0 : i32
    %c0_i32_0 = arith.constant 0 : i32
    %c0_i32_1 = arith.constant 0 : i32
    return %c0_i32, %c0_i32_0 : i32, i32
  }
  func.func @transform_3(%arg0: i32) -> (i32, i32) {
    %c0_i32 = arith.constant 0 : i32
    %c0_i32_0 = arith.constant 0 : i32
    %c0_i32_1 = arith.constant 0 : i32
    return %c0_i32, %c0_i32_0 : i32, i32
  }
  func.func @transform_4(%arg0: i32) -> (i32, i32) {
    %c0_i32 = arith.constant 0 : i32
    %c0_i32_0 = arith.constant 0 : i32
    %c0_i32_1 = arith.constant 0 : i32
    return %c0_i32, %c0_i32_0 : i32, i32
  }
  func.func @transform_5(%arg0: i32) -> (i32, i32) {
    %c0_i32 = arith.constant 0 : i32
    %c0_i32_0 = arith.constant 0 : i32
    %c0_i32_1 = arith.constant 0 : i32
    return %c0_i32, %c0_i32_0 : i32, i32
  }
  func.func @transform_6(%arg0: i32) -> (i32, i32) {
    %c0_i32 = arith.constant 0 : i32
    %c0_i32_0 = arith.constant 0 : i32
    %c0_i32_1 = arith.constant 0 : i32
    return %c0_i32, %c0_i32_0 : i32, i32
  }
  func.func @transform_7(%arg0: i32) -> (i32, i32) {
    %c0_i32 = arith.constant 0 : i32
    %c0_i32_0 = arith.constant 0 : i32
    return %arg0, %c0_i32 : i32, i32
  }
}

</mosaic_0001>

<bundles_post_ra>
// kernel: linearnet_forward.1
= control target key start
LH: loop header
LB: loop body
LE: loop exit
PB: predicated region body
PF: predicated region fallthrough
CT: control target
= control target key end

     0   :  { %s1033_s0 = inlined_call_operand.vmem [shape: f32[8,256], index: 0, kind: input, shape index: {}]   ;;  %s1034_s1 = inlined_call_operand.vmem [shape: bf16[256,256], index: 1, kind: input, shape index: {}]   ;;  %s1035_s2 = inlined_call_operand.vmem [shape: f32[1,256], index: 2, kind: input, shape index: {}]   ;;  %s1036_s3 = inlined_call_operand.vmem [shape: bf16[256,128], index: 3, kind: input, shape index: {}]   ;;  %s1037_s4 = inlined_call_operand.vmem [shape: f32[1,128], index: 4, kind: input, shape index: {}]   ;;  %s1038_s5 = inlined_call_operand.vmem [shape: bf16[128,128], index: 5, kind: input, shape index: {}]   ;;  %s1039_s6 = inlined_call_operand.vmem [shape: f32[1,128], index: 6, kind: input, shape index: {}]   ;;  %s1040_s7 = inlined_call_operand.hbm [shape: f32[8,128], index: 7, kind: output, shape index: {}]  }
   0x1   :  { %v706_v0 = vld [vmem:[%s1034_s1 + $0x74] ss:$8 sps:$4 sm:$0xff]   ;;  %v708_v1 = vld [vmem:[%s1034_s1 + $0x70] ss:$8 sps:$4 sm:$0xff]   ;;  %v709_v2 = vld [vmem:[%s1034_s1 + $0x64] ss:$8 sps:$4 sm:$0xff]  }
   0x2   :  { %236 = vmatprep.subr.bf16.mxu0 %v706_v0  ;;  %v711_v3 = vld [vmem:[%s1034_s1 + $0x60] ss:$8 sps:$4 sm:$0xff]   ;;  %v712_v4 = vld [vmem:[%s1034_s1 + $0x54] ss:$8 sps:$4 sm:$0xff]   ;;  %v714_v5 = vld [vmem:[%s1034_s1 + $0x50] ss:$8 sps:$4 sm:$0xff]  }
   0x3   :  { %237 = vmatpush1.bf16.msra.mxu0 %v708_v1  ;;  %v715_v6 = vld [vmem:[%s1034_s1 + $0x44] ss:$8 sps:$4 sm:$0xff]   ;;  %v717_v7 = vld [vmem:[%s1034_s1 + $0x40] ss:$8 sps:$4 sm:$0xff]   ;;  %v718_v8 = vld [vmem:[%s1034_s1 + $0x34] ss:$8 sps:$4 sm:$0xff]  }
   0x4   :  { %238 = vmatprep.subr.bf16.mxu0 %v709_v2  ;;  %v720_v9 = vld [vmem:[%s1034_s1 + $0x30] ss:$8 sps:$4 sm:$0xff]   ;;  %v721_v10 = vld [vmem:[%s1034_s1 + $0x24] ss:$8 sps:$4 sm:$0xff]   ;;  %v723_v11 = vld [vmem:[%s1034_s1 + $0x20] ss:$8 sps:$4 sm:$0xff]  }
   0x5   :  { %v724_v12 = vld [vmem:[%s1034_s1 + $0x14] ss:$8 sps:$4 sm:$0xff]   ;;  %v726_v13 = vld [vmem:[%s1034_s1 + $0x10] ss:$8 sps:$4 sm:$0xff]   ;;  %v29_v14 = vld [vmem:[%s1033_s0 + $0x8] sm:$0xff] }
   0x6   :  { %v727_v15 = vld [vmem:[%s1034_s1 + $0x4] ss:$8 sps:$4 sm:$0xff]   ;;  %v31_v16 = vpack.c.bf16 %v29_v14, %v29_v14  ;;  %v754_v17 = vld [vmem:[%s1036_s3 + $0x78] sm:$0xff]   ;;  %v756_v19 = vld [vmem:[%s1036_s3 + $0x70] sm:$0xff]  }
   0x7   :  { %239 = vmatpush1.bf16.msra.mxu0 %v711_v3  ;;  %v755_v18 = vld [vmem:[%s1036_s3 + $0x38] sm:$0xff]   ;;  %v729_v20 = vld [vmem:[%s1034_s1] ss:$8 sps:$4 sm:$0xff]   ;;  %652 = vmatprep.subr.bf16.mxu1 %v754_v17  ;;  %v757_v21 = vld [vmem:[%s1036_s3 + $0x30] sm:$0xff]  }
   0x8   :  { %240 = vmatprep.subr.bf16.mxu0 %v712_v4  ;;  %268 = vmatprep.mubr.bf16.mxu0 %v31_v16  ;;  %v758_v22 = vld [vmem:[%s1036_s3 + $0x68] sm:$0xff]   ;;  %v730_v23 = vld [vmem:[%s1034_s1 + $0xf4] ss:$8 sps:$4 sm:$0xff]   ;;  %v732_v24 = vld [vmem:[%s1034_s1 + $0xf0] ss:$8 sps:$4 sm:$0xff]  }
   0x9   :  { %653 = vmatpush3.bf16.msra.mxu1 %v755_v18  ;;  %v759_v25 = vld [vmem:[%s1036_s3 + $0x28] sm:$0xff]   ;;  %v760_v26 = vld [vmem:[%s1036_s3 + $0x60] sm:$0xff]   ;;  %v736_v30 = vld [vmem:[%s1034_s1 + $0xd4] ss:$8 sps:$4 sm:$0xff]  }
   0xa   :  { %654 = vmatprep.subr.bf16.mxu1 %v756_v19  ;;  %v733_v27 = vld [vmem:[%s1034_s1 + $0xe4] ss:$8 sps:$4 sm:$0xff]   ;;  %v735_v28 = vld [vmem:[%s1034_s1 + $0xe0] ss:$8 sps:$4 sm:$0xff]   ;;  %v762_v31 = vld [vmem:[%s1036_s3 + $0x58] sm:$0xff]  }
   0xb   :  { %241 = vmatpush1.bf16.msra.mxu0 %v714_v5  ;;  %v761_v29 = vld [vmem:[%s1036_s3 + $0x20] sm:$0xff]   ;;  %v763_v32 = vld [vmem:[%s1036_s3 + $0x18] sm:$0xff]   ;;  %v764_v34 = vld [vmem:[%s1036_s3 + $0x50] sm:$0xff]  }
   0xc   :  { %242 = vmatprep.subr.bf16.mxu0 %v715_v6  ;;  %v738_v33 = vld [vmem:[%s1034_s1 + $0xd0] ss:$8 sps:$4 sm:$0xff]   ;;  %v739_v35 = vld [vmem:[%s1034_s1 + $0xc4] ss:$8 sps:$4 sm:$0xff]  }
   0xd   :  { %655 = vmatpush3.bf16.msra.mxu1 %v757_v21  ;;  %v765_v36 = vld [vmem:[%s1036_s3 + $0x10] sm:$0xff]  }
   0xe   :  { %656 = vmatprep.subr.bf16.mxu1 %v758_v22 }
   0xf   :  { %243 = vmatpush1.bf16.msra.mxu0 %v717_v7 }
  0x10   :  { %244 = vmatprep.subr.bf16.mxu0 %v718_v8 }
  0x11   :  { %657 = vmatpush3.bf16.msra.mxu1 %v759_v25 }
  0x12   :  { %658 = vmatprep.subr.bf16.mxu1 %v760_v26 }
  0x13   :  { %245 = vmatpush1.bf16.msra.mxu0 %v720_v9 }
  0x14   :  { %246 = vmatprep.subr.bf16.mxu0 %v721_v10 }
  0x15   :  { %659 = vmatpush3.bf16.msra.mxu1 %v761_v29 }
  0x16   :  { %660 = vmatprep.subr.bf16.mxu1 %v762_v31 }
  0x17   :  { %247 = vmatpush1.bf16.msra.mxu0 %v723_v11 }
  0x18   :  { %248 = vmatprep.subr.bf16.mxu0 %v724_v12 }
  0x19   :  { %661 = vmatpush3.bf16.msra.mxu1 %v763_v32 }
  0x1b   :  { %249 = vmatpush1.bf16.msra.mxu0 %v726_v13 }
  0x1c   :  { %250 = vmatprep.subr.bf16.mxu0 %v727_v15 }
  0x1f   :  { %251 = vmatpush1.bf16.msra.mxu0 %v729_v20 }
  0x20   :  { %252 = vmatprep.subr.bf16.mxu0 %v730_v23 }
  0x23   :  { %253 = vmatpush2.bf16.msra.mxu0 %v732_v24 }
  0x24   :  { %254 = vmatprep.subr.bf16.mxu0 %v733_v27 }
  0x27   :  { %255 = vmatpush2.bf16.msra.mxu0 %v735_v28 }
  0x28   :  { %256 = vmatprep.subr.bf16.mxu0 %v736_v30 }
  0x29   :  { %12 = vsyncpa [#allocation3], 0  ;;  %v741_v37 = vld [vmem:[%s1034_s1 + $0xc0] ss:$8 sps:$4 sm:$0xff]   ;;  %662 = vmatprep.subr.bf16.mxu1 %v764_v34  ;;  %v742_v38 = vld [vmem:[%s1034_s1 + $0xb4] ss:$8 sps:$4 sm:$0xff]   ;;  %v66_v53 = vlaneseq }
  0x2a   :  { %663 = vmatpush3.bf16.msra.mxu1 %v765_v36  ;;  %v744_v39 = vld [vmem:[%s1034_s1 + $0xb0] ss:$8 sps:$4 sm:$0xff]   ;;  %v745_v40 = vld [vmem:[%s1034_s1 + $0xa4] ss:$8 sps:$4 sm:$0xff]   ;;  %v747_v41 = vld [vmem:[%s1034_s1 + $0xa0] ss:$8 sps:$4 sm:$0xff]  }
  0x2b   :  { %257 = vmatpush2.bf16.msra.mxu0 %v738_v33  ;;  %v748_v42 = vld [vmem:[%s1034_s1 + $0x94] ss:$8 sps:$4 sm:$0xff]   ;;  %v750_v43 = vld [vmem:[%s1034_s1 + $0x90] ss:$8 sps:$4 sm:$0xff]   ;;  %v751_v44 = vld [vmem:[%s1034_s1 + $0x84] ss:$8 sps:$4 sm:$0xff]  }
  0x2c   :  { %258 = vmatprep.subr.bf16.mxu0 %v739_v35  ;;  %v753_v45 = vld [vmem:[%s1034_s1 + $0x80] ss:$8 sps:$4 sm:$0xff]   ;;  %v804_v52 = vmov 0.0   ;;  %v67_v54 = vshrl.u32 %v66_v53, 7  ;;  %v770_v5 = vld [vmem:[%s1038_s5 + $0x38] sm:$0xff]   ;;  %v771_v7 = vld [vmem:[%s1038_s5 + $0x30] sm:$0xff]  }
  0x2d   :  { %v28_v46 = vld [vmem:[%s1033_s0] sm:$0xff]  ;;  %v766_v48 = vld [vmem:[%s1036_s3 + $0x48] sm:$0xff]   ;;  %v774_v10 = vld [vmem:[%s1038_s5 + $0x18] sm:$0xff]   ;;  %vm805_vm0 = vmmov 0  }
  0x2e   :  { %v30_v47 = vpack.c.bf16 %v28_v46, %v28_v46  ;;  %v767_v49 = vld [vmem:[%s1036_s3 + $0x8] sm:$0xff]   ;;  %664 = vmatprep.subr.bf16.mxu1 %v766_v48  ;;  %v768_v50 = vld [vmem:[%s1036_s3 + $0x40] sm:$0xff]   ;;  %v68_v55 = vsub.s32 0, %v67_v54  ;;  %v72_v57 = vsub.s32 1, %v67_v54  ;;  %v775_v11 = vld [vmem:[%s1038_s5 + $0x10] sm:$0xff]  }
  0x2f   :  { %259 = vmatpush2.bf16.msra.mxu0 %v741_v37  ;;  %665 = vmatpush3.bf16.msra.mxu1 %v767_v49  ;;  %v769_v51 = vld [vmem:[%s1036_s3] sm:$0xff]   ;;  %v772_v8 = vld [vmem:[%s1038_s5 + $0x28] sm:$0xff]  }
  0x30   :  { %260 = vmatprep.subr.bf16.mxu0 %v742_v38  ;;  %666 = vmatprep.subr.bf16.mxu1 %v768_v50  ;;  %v64_v56 = vld [vmem:[%s1035_s2] sm:$0x3]  ;;  %v776_v12 = vld [vmem:[%s1038_s5 + $0x8] sm:$0xff]  }
  0x31   :  { %v69_v58 = vrot.slane %v64_v56, %v68_v55  ;;  %v73_v59 = vrot.slane %v64_v56, %v72_v57  ;;  %v773_v9 = vld [vmem:[%s1038_s5 + $0x20] sm:$0xff]  }
  0x32   :  { %v777_v13 = vld [vmem:[%s1038_s5] sm:$0xff]  }
  0x33   :  { %261 = vmatpush2.bf16.msra.mxu0 %v744_v39  ;;  %667 = vmatpush3.bf16.msra.mxu1 %v769_v51  ;;  %v626_v15 = vld [vmem:[%s1037_s4] ss:$0 sm:$0xff]  ;;  %s806_s4 = smov [#allocation2]  }
  0x34   :  { %262 = vmatprep.subr.bf16.mxu0 %v745_v40  ;;  %683 = vmatprep.subr.bf16.mxu1 %v804_v52  ;;  %v643_v23 = vld [vmem:[%s1039_s6] ss:$0 sm:$0xff]  ;;  %s586_s5 = sshll.u32 %s806_s4, 4  ;;  %s587_s5 = int_to_ptr.vmem [resolvable:$true] %s586_s5 }
  0x35   :  { %s782_s6 = scalar_lea.vmem %s587_s5, 128  ;;  %p787_p1 = scmp.lt.s32.totalorder %s587_s5, %s587_s5 }
  0x36   :  { %p783_p0 = scmp.ne.s32.totalorder %s587_s5, %s782_s6  ;;  %p788_p2 = scmp.lt.s32.totalorder %s782_s6, %s782_s6 }
  0x37   :  { %263 = vmatpush2.bf16.msra.mxu0 %v747_v41 }
  0x38   :  { %264 = vmatprep.subr.bf16.mxu0 %v748_v42  ;;  %p789_p3 = por %p788_p2, %p787_p1 }
  0x3a   :  { %p790_p4 = pnand %p789_p3, %p783_p0 }
  0x3b   :  { %265 = vmatpush2.bf16.msra.mxu0 %v750_v43 }
  0x3c   :  { %266 = vmatprep.subr.bf16.mxu0 %v751_v44 }
  0x3f   :  { %267 = vmatpush2.bf16.msra.mxu0 %v753_v45 }
  0x42   :  { %269 = vmatmul.mubr.bf16.vlgmr.msra.gmra.mxu0 %v30_v47 }
 0x102   :  { %v270_v60 = vpop.f32.mrf.mxu0 }
 0x103   :  { %v271_v61 = vadd.f32 %v270_v60, %v69_v58 }
 0x104   :  { %v272_v62 = vpop.f32.mrf.mxu0 }
 0x105   :  { %v273_v63 = vadd.f32 %v272_v62, %v73_v59  ;;  %v277_v0 = vmax.f32 %v271_v61, 0.0 }
 0x106   :  { %v274_v1 = vpop.f32.mrf.mxu0 }
 0x107   :  { %v278_v2 = vmax.f32 %v273_v63, 0.0  ;;  %v279_v6 = vpack.c.bf16 %v277_v0, %v277_v0 }
 0x108   :  { %v275_v3 = vpop.f32.mrf.mxu0 }
 0x109   :  { %v280_v4 = vpack.c.bf16 %v278_v2, %v278_v2 }
 0x10b   :  { %448 = vmatprep.mubr.bf16.mxu1 %v280_v4 }
 0x10c   :  { %449 = vmatmul.mubr.bf16.vlgmr.msra.gmra.mxu1 %v279_v6 }
 0x10d   :  { %684 = vmatpush3.bf16.msra.mxu1 %v770_v5  ;;  %699 = vmatprep.mubr.msk.bf16.mxu1 %vm805_vm0, %v804_v52 }
 0x10e   :  { %685 = vmatprep.subr.bf16.mxu1 %v804_v52 }
 0x111   :  { %686 = vmatpush3.bf16.msra.mxu1 %v771_v7 }
 0x112   :  { %687 = vmatprep.subr.bf16.mxu1 %v804_v52 }
 0x115   :  { %688 = vmatpush3.bf16.msra.mxu1 %v772_v8 }
 0x116   :  { %689 = vmatprep.subr.bf16.mxu1 %v804_v52 }
 0x119   :  { %690 = vmatpush3.bf16.msra.mxu1 %v773_v9 }
 0x11a   :  { %691 = vmatprep.subr.bf16.mxu1 %v804_v52 }
 0x11d   :  { %692 = vmatpush3.bf16.msra.mxu1 %v774_v10 }
 0x11e   :  { %693 = vmatprep.subr.bf16.mxu1 %v804_v52 }
 0x121   :  { %694 = vmatpush3.bf16.msra.mxu1 %v775_v11 }
 0x122   :  { %695 = vmatprep.subr.bf16.mxu1 %v804_v52 }
 0x125   :  { %696 = vmatpush3.bf16.msra.mxu1 %v776_v12 }
 0x126   :  { %697 = vmatprep.subr.bf16.mxu1 %v804_v52 }
 0x129   :  { %698 = vmatpush3.bf16.msra.mxu1 %v777_v13 }
 0x1cc   :  { %v668_v14 = vpop.f32.mrf.mxu1 }
 0x1ce   :  { %v669_v16 = vpop.f32.mrf.mxu1 }
 0x1cf   :  { %v670_v17 = vadd.f32 %v669_v16, %v668_v14 }
 0x1d0   :  { %v671_v18 = vpop.f32.mrf.mxu1 }
 0x1d1   :  { %v451_v19 = vadd.f32 %v670_v17, %v626_v15 }
 0x1d2   :  { %v672_v20 = vpop.f32.mrf.mxu1 }
 0x1d3   :  { %v456_v21 = vmax.f32 %v451_v19, 0.0 }
 0x1d5   :  { %v457_v22 = vpack.c.bf16 %v456_v21, %v456_v21 }
 0x1d7   :  { %700 = vmatmul.mubr.bf16.vlgmr.msra.gmra.mxu1 %v457_v22 }
 0x297   :  { %v563_v24 = vpop.f32.mrf.mxu1 }
 0x298   :  { %v564_v25 = vadd.f32 %v643_v23, %v563_v24 }
 0x299   :  { %v701_v26 = vpop.f32.mrf.mxu1 }
 0x29a   :  { %569 = vmax.xlane.f32.xlu0 %v564_v25 }
 0x29b   :  { %v566_v27 = vpop.f32.mrf.mxu1 }
 0x29d   :  { %v702_v28 = vpop.f32.mrf.mxu1 }
 0x323   :  { %v570_v29 = vpop.xlane.xlu0 %569 }
 0x324   :  { %v571_v30 = vsub.f32 %v564_v25, %v570_v29 }
 0x326   :  { %v572_v31 = vmul.f32 1.442695, %v571_v30 }
 0x328   :  { %778 = vpow2.f32 %v572_v31 }
 0x335   :  { %v779_v32 = vpop.eup %778 }
 0x336   :  { %574 = vadd.xlane.f32.xlu0 %v779_v32 }
 0x3bf   :  { %v575_v33 = vpop.xlane.xlu0 %574 }
 0x3c0   :  { %780 = vlog2.f32 %v575_v33 }
 0x3cd   :  { %v781_v34 = vpop.eup %780 }
 0x3ce   :  { %v577_v35 = vmul.f32 0.6931472, %v781_v34 }
 0x3d0   :  { %v578_v36 = vsub.f32 %v571_v30, %v577_v35 }
 0x3d2   :  { %579 = vst [vmem:[#allocation2] sm:$0xff] %v578_v36 }
 0x3d3   :  { %793 = shalt.err (!%p790_p4)
}
 0x3d4   :  { %589 = dma.vmem_to_hbm [thread:$0]  %s587_s5, 128, %s1040_s7, [#allocation3]  }
 0x3d5   :  { %802 = dma.done.wait [#allocation3], 128  }
 0x3d6   :  { %803 = vsyncadd [#allocation3], 4294967168 }
 0x3d7   :  { %593 = vsyncpa [#allocation3], 1 }

</bundles_post_ra>
